<compile_context>
chip_gen: v5e
topology: v5e:2x2
jax: 0.10.0
libtpu: 0.0.40
codegen_flags: <defaults>
</compile_context>

<pallas_src>
import functools

import jax
import jax.numpy as jnp
from jax import lax
from jax.experimental import pallas as pl
from jax.experimental.pallas import tpu as pltpu

_LANE = 128
_SUBLANE = 8


def _round_up(x, m):
    return (x + m - 1) // m * m


def _linear_kernel(x_ref, w_ref, b_ref, o_ref):
    # x_ref: (TM, H)          activation tile
    # w_ref: (O_pad, H)       weight in native PyTorch [out, in] layout
    # b_ref: (1, O_pad)       bias (broadcast over rows)
    # o_ref: (TM, O_pad)
    acc = lax.dot_general(
        x_ref[...],
        w_ref[...],
        dimension_numbers=(((1,), (1,)), ((), ())),  # contract H with H (RHS transposed)
        preferred_element_type=jnp.float32,
    )
    o_ref[...] = (acc + b_ref[...]).astype(o_ref.dtype)


@functools.partial(jax.jit, static_argnames=("block_m",))
def decoder_forward(x, weight, bias, *, block_m=512):
    """x: [B, S, H]; weight: [O, H] (PyTorch layout); bias: [O] -> [B, S, O]."""
    B, S, H = x.shape
    O = weight.shape[0]
    M = B * S
    dtype = x.dtype
    itemsize = jnp.dtype(dtype).itemsize

    # ---- glue: flatten leading dims, pad to TPU-friendly extents ----------
    x2d = x.reshape(M, H)

    # Lane-dense output: round O up to a multiple of 128.  Padded weight rows
    # and bias entries are zero, so padded output columns are zero and are
    # sliced off below.
    O_pad = _round_up(O, _LANE)
    if O_pad != O:
        weight = jnp.pad(weight, ((0, O_pad - O), (0, 0)))
        bias = jnp.pad(bias, (0, O_pad - O))
    b2d = bias.reshape(1, O_pad)

    # Tile M; for tiny M fall back to a single block rounded up to 8 rows.
    tm = block_m if M >= block_m else _round_up(M, _SUBLANE)
    M_pad = _round_up(M, tm)
    if M_pad != M:
        x2d = jnp.pad(x2d, ((0, M_pad - M), (0, 0)))

    grid = (M_pad // tm,)

    cost = pl.CostEstimate(
        flops=2 * M_pad * H * O_pad,
        transcendentals=0,
        bytes_accessed=(M_pad * H + O_pad * H + O_pad + M_pad * O_pad) * itemsize,
    )

    # VMEM budget: double-buffered x/out tiles + resident weight/bias tiles,
    # with 2x headroom, clamped to [32 MiB, 64 MiB] (safe on v5e/v6e/v7x).
    vmem_needed = (
        2 * tm * H * itemsize
        + 2 * tm * O_pad * itemsize
        + O_pad * H * itemsize
        + O_pad * itemsize
    )
    vmem_limit = min(64 * 1024 * 1024, max(32 * 1024 * 1024, int(2 * vmem_needed)))

    out2d = pl.pallas_call(
        _linear_kernel,
        out_shape=jax.ShapeDtypeStruct((M_pad, O_pad), dtype),
        grid_spec=pltpu.PrefetchScalarGridSpec(
            num_scalar_prefetch=0,
            grid=grid,
            in_specs=[
                pl.BlockSpec((tm, H), lambda i: (i, 0)),       # activation tile
                pl.BlockSpec((O_pad, H), lambda i: (0, 0)),    # weight, native [O, H]
                pl.BlockSpec((1, O_pad), lambda i: (0, 0)),    # bias
            ],
            out_specs=pl.BlockSpec((tm, O_pad), lambda i: (i, 0)),
        ),
        compiler_params=pltpu.CompilerParams(
            dimension_semantics=("parallel",),
            vmem_limit_bytes=vmem_limit,
        ),
        cost_estimate=cost,
    )(x2d, weight, b2d)

    return out2d[:M, :O].reshape(B, S, O)


if __name__ == "__main__":
    # Small shapes consistent with the module: batch=2, seq=8, hidden=32, output=16
    batch, seq, hidden_size, output_size = 2, 8, 32, 16

    key = jax.random.PRNGKey(0)
    kx, kw, kb = jax.random.split(key, 3)

    x = jax.random.normal(kx, (batch, seq, hidden_size), dtype=jnp.float32)

    # Deterministic parameter init (PyTorch-like uniform(-1/sqrt(H), 1/sqrt(H)))
    bound = 1.0 / (hidden_size ** 0.5)
    weight = jax.random.uniform(kw, (output_size, hidden_size),
                                minval=-bound, maxval=bound, dtype=jnp.float32)
    bias = jax.random.uniform(kb, (output_size,),
                              minval=-bound, maxval=bound, dtype=jnp.float32)

    out = decoder_forward(x, weight, bias)
    out = jax.block_until_ready(out)

    # Reference check in plain JAX
    ref = x @ weight.T + bias
    assert out.shape == (batch, seq, output_size)
    assert jnp.allclose(out, ref, atol=1e-5, rtol=1e-5)

    print("KERNEL_OK")
</pallas_src>

<mosaic_0001>
module attributes {stable_mosaic.version = 11 : i64} {
  func.func @_linear_kernel(%arg0: i32, %arg1: memref<16x32xf32, #tpu.memory_space<vmem>>, %arg2: memref<128x32xf32, #tpu.memory_space<vmem>>, %arg3: memref<1x128xf32, #tpu.memory_space<vmem>>, %arg4: memref<16x128xf32, #tpu.memory_space<vmem>>) attributes {dimension_semantics = [#tpu.dimension_semantics<parallel>], iteration_bounds = array<i64: 1>, scalar_prefetch = 0 : i64, scratch_operands = 0 : i64, tpu.core_type = #tpu.core_type<tc>, window_params = [{transform_indices = @transform_0, window_bounds = array<i64: 16, 32>}, {pipeline_mode = #tpu.pipeline_mode<synchronous>, transform_indices = @transform_1, window_bounds = array<i64: 128, 32>}, {pipeline_mode = #tpu.pipeline_mode<synchronous>, transform_indices = @transform_2, window_bounds = array<i64: 1, 128>}, {transform_indices = @transform_3, window_bounds = array<i64: 16, 128>}]} {
    %c0 = arith.constant 0 : index
    %c0_0 = arith.constant 0 : index
    %0 = vector.load %arg1[%c0, %c0_0] : memref<16x32xf32, #tpu.memory_space<vmem>>, vector<16x32xf32>
    %c0_1 = arith.constant 0 : index
    %c0_2 = arith.constant 0 : index
    %1 = vector.load %arg2[%c0_1, %c0_2] : memref<128x32xf32, #tpu.memory_space<vmem>>, vector<128x32xf32>
    %cst = arith.constant dense<0.000000e+00> : vector<16x128xf32>
    %2 = tpu.matmul %0, %1, %cst {dimension_numbers = #tpu.dot_dimension_numbers<[1], [1], [0], [0], [0, 0, 1, 0], [], []>} : vector<16x32xf32>, vector<128x32xf32>, vector<16x128xf32> -> vector<16x128xf32>
    %c0_3 = arith.constant 0 : index
    %c0_4 = arith.constant 0 : index
    %3 = vector.load %arg3[%c0_3, %c0_4] : memref<1x128xf32, #tpu.memory_space<vmem>>, vector<1x128xf32>
    %4 = vector.broadcast %3 : vector<1x128xf32> to vector<16x128xf32>
    %5 = arith.addf %2, %4 : vector<16x128xf32>
    %c0_5 = arith.constant 0 : index
    %c0_6 = arith.constant 0 : index
    %6 = vector.load %arg4[%c0_5, %c0_6] : memref<16x128xf32, #tpu.memory_space<vmem>>, vector<16x128xf32>
    tpu.vector_store %arg4[%c0_5, %c0_6], %5 {strides = array<i32>} : memref<16x128xf32, #tpu.memory_space<vmem>>, vector<16x128xf32>,
    return
  }
  func.func @transform_0(%arg0: i32) -> (i32, i32) {
    %c0_i32 = arith.constant 0 : i32
    %c0_i32_0 = arith.constant 0 : i32
    return %arg0, %c0_i32 : i32, i32
  }
  func.func @transform_1(%arg0: i32) -> (i32, i32) {
    %c0_i32 = arith.constant 0 : i32
    %c0_i32_0 = arith.constant 0 : i32
    %c0_i32_1 = arith.constant 0 : i32
    return %c0_i32, %c0_i32_0 : i32, i32
  }
  func.func @transform_2(%arg0: i32) -> (i32, i32) {
    %c0_i32 = arith.constant 0 : i32
    %c0_i32_0 = arith.constant 0 : i32
    %c0_i32_1 = arith.constant 0 : i32
    return %c0_i32, %c0_i32_0 : i32, i32
  }
  func.func @transform_3(%arg0: i32) -> (i32, i32) {
    %c0_i32 = arith.constant 0 : i32
    %c0_i32_0 = arith.constant 0 : i32
    return %arg0, %c0_i32 : i32, i32
  }
}

</mosaic_0001>

<bundles_post_ra>
// kernel: decoder_forward.1
= control target key start
LH: loop header
LB: loop body
LE: loop exit
PB: predicated region body
PF: predicated region fallthrough
CT: control target
= control target key end

     0   :  { %vm36_vm0 = vcmask 261120   ;;  %s272_s1 = inlined_call_operand.vmem [shape: f32[128,32], index: 1, kind: input, shape index: {}]   ;;  %s273_s2 = inlined_call_operand.vmem [shape: f32[1,128], index: 2, kind: input, shape index: {}]   ;;  %s274_s0 = inlined_call_operand.vmem [shape: f32[16,32], index: 0, kind: input, shape index: {}]   ;;  %s275_s3 = inlined_call_operand.vmem [shape: f32[16,128], index: 3, kind: output, shape index: {}]  }
   0x1   :  { %v31_v0 = vld [vmem:[%s272_s1 + $0x78] sm:$0xff]  ;;  %v30_v1 = vld [vmem:[%s272_s1 + $0x70] sm:$0xff]  ;;  %v29_v2 = vld [vmem:[%s272_s1 + $0x68] sm:$0xff] }
   0x2   :  { %120 = vmatpush.xpose.msk.msra.mxu0 %vm36_vm0, %v31_v0  ;;  %138 = vmatpush.xpose.msk.msra.mxu1 %vm36_vm0, %v31_v0  ;;  %v28_v3 = vld [vmem:[%s272_s1 + $0x60] sm:$0xff]  ;;  %v27_v4 = vld [vmem:[%s272_s1 + $0x58] sm:$0xff]  ;;  %v26_v5 = vld [vmem:[%s272_s1 + $0x50] sm:$0xff] }
   0x3   :  { %v25_v6 = vld [vmem:[%s272_s1 + $0x48] sm:$0xff]  ;;  %v24_v7 = vld [vmem:[%s272_s1 + $0x40] sm:$0xff]  ;;  %v23_v8 = vld [vmem:[%s272_s1 + $0x38] sm:$0xff] }
   0x4   :  { %v22_v9 = vld [vmem:[%s272_s1 + $0x30] sm:$0xff]  ;;  %v21_v10 = vld [vmem:[%s272_s1 + $0x28] sm:$0xff]  ;;  %v20_v11 = vld [vmem:[%s272_s1 + $0x20] sm:$0xff] }
   0x5   :  { %v19_v12 = vld [vmem:[%s272_s1 + $0x18] sm:$0xff]  ;;  %v18_v13 = vld [vmem:[%s272_s1 + $0x10] sm:$0xff]  ;;  %v17_v14 = vld [vmem:[%s272_s1 + $0x8] sm:$0xff] }
   0x6   :  { %121 = vmatpush.xpose.msk.msra.mxu0 %vm36_vm0, %v30_v1  ;;  %139 = vmatpush.xpose.msk.msra.mxu1 %vm36_vm0, %v30_v1  ;;  %v16_v15 = vld [vmem:[%s272_s1] sm:$0xff]  ;;  %v15_v17 = vld [vmem:[%s274_s0 + $0x8] sm:$0xff] }
   0x7   :  { %v14_v16 = vld [vmem:[%s274_s0] sm:$0xff] }
   0x8   :  { %v154_v18 = vld [vmem:[%s273_s2] ss:$0 sm:$0xff] }
   0xa   :  { %122 = vmatpush.xpose.msk.msra.mxu0 %vm36_vm0, %v29_v2  ;;  %140 = vmatpush.xpose.msk.msra.mxu1 %vm36_vm0, %v29_v2 }
   0xe   :  { %123 = vmatpush.xpose.msk.msra.mxu0 %vm36_vm0, %v28_v3  ;;  %141 = vmatpush.xpose.msk.msra.mxu1 %vm36_vm0, %v28_v3 }
  0x12   :  { %124 = vmatpush.xpose.msk.msra.mxu0 %vm36_vm0, %v27_v4  ;;  %142 = vmatpush.xpose.msk.msra.mxu1 %vm36_vm0, %v27_v4 }
  0x16   :  { %125 = vmatpush.xpose.msk.msra.mxu0 %vm36_vm0, %v26_v5  ;;  %143 = vmatpush.xpose.msk.msra.mxu1 %vm36_vm0, %v26_v5 }
  0x1a   :  { %126 = vmatpush.xpose.msk.msra.mxu0 %vm36_vm0, %v25_v6  ;;  %144 = vmatpush.xpose.msk.msra.mxu1 %vm36_vm0, %v25_v6 }
  0x1e   :  { %127 = vmatpush.xpose.msk.msra.mxu0 %vm36_vm0, %v24_v7  ;;  %145 = vmatpush.xpose.msk.msra.mxu1 %vm36_vm0, %v24_v7 }
  0x22   :  { %128 = vmatpush.xpose.msk.msra.mxu0 %vm36_vm0, %v23_v8  ;;  %146 = vmatpush.xpose.msk.msra.mxu1 %vm36_vm0, %v23_v8 }
  0x26   :  { %129 = vmatpush.xpose.msk.msra.mxu0 %vm36_vm0, %v22_v9  ;;  %147 = vmatpush.xpose.msk.msra.mxu1 %vm36_vm0, %v22_v9 }
  0x2a   :  { %130 = vmatpush.xpose.msk.msra.mxu0 %vm36_vm0, %v21_v10  ;;  %148 = vmatpush.xpose.msk.msra.mxu1 %vm36_vm0, %v21_v10 }
  0x2e   :  { %131 = vmatpush.xpose.msk.msra.mxu0 %vm36_vm0, %v20_v11  ;;  %149 = vmatpush.xpose.msk.msra.mxu1 %vm36_vm0, %v20_v11 }
  0x32   :  { %132 = vmatpush.xpose.msk.msra.mxu0 %vm36_vm0, %v19_v12  ;;  %150 = vmatpush.xpose.msk.msra.mxu1 %vm36_vm0, %v19_v12 }
  0x36   :  { %133 = vmatpush.xpose.msk.msra.mxu0 %vm36_vm0, %v18_v13  ;;  %151 = vmatpush.xpose.msk.msra.mxu1 %vm36_vm0, %v18_v13 }
  0x3a   :  { %134 = vmatpush.xpose.msk.msra.mxu0 %vm36_vm0, %v17_v14  ;;  %152 = vmatpush.xpose.msk.msra.mxu1 %vm36_vm0, %v17_v14 }
  0x3e   :  { %135 = vmatpush.xpose.msk.msra.mxu0 %vm36_vm0, %v16_v15  ;;  %153 = vmatpush.xpose.msk.msra.mxu1 %vm36_vm0, %v16_v15 }
  0x41   :  { %136 = vmatmul.msk.f32.vlgmr.msra.gmra.mxu0 %vm36_vm0, %v14_v16  ;;  %137 = vmatmul.msk.f32.vlgmr.msra.gmra.mxu1 %vm36_vm0, %v15_v17 }
  0xbe   :  { %v108_v19 = vpop.f32.mrf.mxu0  ;;  %v111_v20 = vpop.f32.mrf.mxu1 }
  0xbf   :  { %v109_v21 = vadd.f32 %v154_v18, %v108_v19  ;;  %v112_v22 = vadd.f32 %v154_v18, %v111_v20 }
  0xc1   :  { %114 = vst [vmem:[%s275_s3] sm:$0xff] %v109_v21 }
  0xc2   :  { %115 = vst [vmem:[%s275_s3 + $0x8] sm:$0xff] %v112_v22 }

</bundles_post_ra>
